<compile_context>
chip_gen: v7x
topology: tpu7x:2x2x1
jax: 0.10.0
libtpu: 0.0.40
codegen_flags: <defaults>
</compile_context>

<pallas_src>
import functools

import numpy as np
import jax
import jax.numpy as jnp
from jax import lax
from jax.experimental import pallas as pl
from jax.experimental.pallas import tpu as pltpu


_BN_EPS = 1e-5


def _fold_bn(gamma, beta, mean, var):
    scale = gamma / jnp.sqrt(var + _BN_EPS)
    bias = beta - mean * scale
    return scale, bias


# ----------------------------------------------------------------------------
# Pallas kernels
# ----------------------------------------------------------------------------
def _stem_kernel(x_ref, w_ref, s_ref, b_ref, *o_refs, splits):
    """Four fused 1x1 conv + folded BN (no relu) sharing a single read of x.

    x_ref: (1, H, W, Cin)  bf16
    w_ref: (Cin, Ctot)     bf16  (output channels of the 4 convs concatenated)
    s_ref/b_ref: (1, Ctot) f32   folded BN scale / bias
    o_refs[k]: (1, H, W, splits[k]) bf16
    """
    _, h, w, cin = x_ref.shape
    m = h * w
    y = jnp.dot(x_ref[0].reshape(m, cin), w_ref[...],
                preferred_element_type=jnp.float32)
    y = y * s_ref[...] + b_ref[...]
    off = 0
    for o_ref, c in zip(o_refs, splits):
        o_ref[...] = y[:, off:off + c].astype(o_ref.dtype).reshape(1, h, w, c)
        off += c


def _conv3x3_bn_kernel(x_ref, w_ref, s_ref, b_ref, o_ref, xpad_ref,
                       *, dil, pad, relu):
    """3x3 (possibly dilated) conv + folded BN (+ optional ReLU), one image/step.

    Padding happens in VMEM scratch; the 9 taps are folded into a single MXU
    contraction with K = 9*Cin.

    x_ref: (1, H, W, Cin)     bf16
    w_ref: (9*Cin, Cout)      bf16  (tap-major, channel-minor -> matches im2col)
    s_ref/b_ref: (1, Cout)    f32
    o_ref: (1, Ho, Wo, Cout)  bf16
    xpad_ref: (Hp, Wp, Cin)   bf16 VMEM scratch
    """
    _, h, w, cin = x_ref.shape
    _, ho, wo, cout = o_ref.shape

    # Zero-pad in VMEM (replaces host-side jnp.pad).
    xpad_ref[...] = jnp.zeros(xpad_ref.shape, xpad_ref.dtype)
    xpad_ref[pad:pad + h, pad:pad + w, :] = x_ref[0]

    # im2col: concat the 9 dilated taps along channels -> one big matmul.
    cols = [xpad_ref[i * dil:i * dil + ho, j * dil:j * dil + wo, :]
            for i in range(3) for j in range(3)]
    patch = jnp.concatenate(cols, axis=-1).reshape(ho * wo, 9 * cin)

    acc = jnp.dot(patch, w_ref[...], preferred_element_type=jnp.float32)
    y = acc * s_ref[...] + b_ref[...]
    if relu:
        y = jnp.maximum(y, 0.0)
    o_ref[...] = y.astype(o_ref.dtype).reshape(1, ho, wo, cout)


def _tail_kernel(b0_ref, b1_ref, b2_ref, sh_ref, w0_ref, w1_ref, w2_ref,
                 s_ref, b_ref, o_ref, *, alpha):
    """ConvLinear (1x1 + BN) on the *virtual* concat of b0/b1/b2 (weight split
    along the contraction dim), fused with out*alpha + shortcut and final ReLU.

    b*_ref: (1, H, W, C)      bf16 branch outputs
    sh_ref: (1, H, W, Cout)   bf16 shortcut branch output
    w*_ref: (C, Cout)         bf16 slices of the 1x1 ConvLinear weight
    s_ref/b_ref: (1, Cout)    f32  folded BN
    o_ref: (1, H, W, Cout)    f32
    """
    _, h, w, c = b0_ref.shape
    cout = o_ref.shape[-1]
    m = h * w
    acc = jnp.dot(b0_ref[0].reshape(m, c), w0_ref[...],
                  preferred_element_type=jnp.float32)
    acc = acc + jnp.dot(b1_ref[0].reshape(m, c), w1_ref[...],
                        preferred_element_type=jnp.float32)
    acc = acc + jnp.dot(b2_ref[0].reshape(m, c), w2_ref[...],
                        preferred_element_type=jnp.float32)
    y = acc * s_ref[...] + b_ref[...]
    y = y * alpha + sh_ref[0].reshape(m, cout).astype(jnp.float32)
    o_ref[...] = jnp.maximum(y, 0.0).reshape(1, h, w, cout)


# ----------------------------------------------------------------------------
# Host-side wrappers (BN folding + pallas_call plumbing; no pads / concats)
# ----------------------------------------------------------------------------
def stem_1x1(x_bf16, param_list):
    """Fused 1x1 convs (b0_0, b1_0, b2_0, shortcut), all relu=False."""
    n, h, w, cin = x_bf16.shape
    ws, ss, bs, splits = [], [], [], []
    for (wt, g, be, mu, var) in param_list:        # wt: (1,1,Cin,Cout)
        cout = int(wt.shape[3])
        ws.append(wt.reshape(wt.shape[2], cout))
        sc, bi = _fold_bn(g, be, mu, var)
        ss.append(sc)
        bs.append(bi)
        splits.append(cout)
    ctot = sum(splits)
    w_all = jnp.concatenate(ws, axis=1).astype(jnp.bfloat16)
    s_all = jnp.concatenate(ss).reshape(1, ctot)
    b_all = jnp.concatenate(bs).reshape(1, ctot)

    kernel = functools.partial(_stem_kernel, splits=tuple(splits))
    flops = 2 * n * h * w * cin * ctot
    bytes_acc = 2 * (n * h * w * cin + cin * ctot + n * h * w * ctot) + 8 * ctot
    return pl.pallas_call(
        kernel,
        out_shape=tuple(jax.ShapeDtypeStruct((n, h, w, c), jnp.bfloat16)
                        for c in splits),
        grid=(n,),
        in_specs=[
            pl.BlockSpec((1, h, w, cin), lambda i: (i, 0, 0, 0)),
            pl.BlockSpec((cin, ctot), lambda i: (0, 0)),
            pl.BlockSpec((1, ctot), lambda i: (0, 0)),
            pl.BlockSpec((1, ctot), lambda i: (0, 0)),
        ],
        out_specs=tuple(pl.BlockSpec((1, h, w, c), lambda i: (i, 0, 0, 0))
                        for c in splits),
        compiler_params=pltpu.CompilerParams(dimension_semantics=("parallel",)),
        cost_estimate=pl.CostEstimate(flops=flops, transcendentals=0,
                                      bytes_accessed=bytes_acc),
    )(x_bf16, w_all, s_all, b_all)


def conv3x3_bn(x_bf16, params, *, padding, dilation, relu):
    """BasicConv 3x3 (stride=1, groups=1) in NHWC; im2col-folded single matmul."""
    wt, g, be, mu, var = params                    # wt: (3,3,Cin,Cout)
    kh, kw, cin, cout = wt.shape
    assert kh == 3 and kw == 3
    n, h, w, _ = x_bf16.shape
    ho = h + 2 * padding - 2 * dilation
    wo = w + 2 * padding - 2 * dilation
    hp, wp = h + 2 * padding, w + 2 * padding
    sc, bi = _fold_bn(g, be, mu, var)
    w2d = wt.reshape(9 * cin, cout).astype(jnp.bfloat16)

    kernel = functools.partial(_conv3x3_bn_kernel, dil=dilation, pad=padding,
                               relu=relu)
    flops = 2 * n * ho * wo * 9 * cin * cout
    bytes_acc = 2 * (n * h * w * cin + 9 * cin * cout + n * ho * wo * cout) + 8 * cout
    return pl.pallas_call(
        kernel,
        out_shape=jax.ShapeDtypeStruct((n, ho, wo, cout), jnp.bfloat16),
        grid=(n,),
        in_specs=[
            pl.BlockSpec((1, h, w, cin), lambda i: (i, 0, 0, 0)),
            pl.BlockSpec((9 * cin, cout), lambda i: (0, 0)),
            pl.BlockSpec((1, cout), lambda i: (0, 0)),
            pl.BlockSpec((1, cout), lambda i: (0, 0)),
        ],
        out_specs=pl.BlockSpec((1, ho, wo, cout), lambda i: (i, 0, 0, 0)),
        scratch_shapes=[pltpu.VMEM((hp, wp, cin), jnp.bfloat16)],
        compiler_params=pltpu.CompilerParams(dimension_semantics=("parallel",)),
        cost_estimate=pl.CostEstimate(flops=flops, transcendentals=0,
                                      bytes_accessed=bytes_acc),
    )(x_bf16, w2d, sc.reshape(1, cout), bi.reshape(1, cout))


def conv_linear_tail(b0, b1, b2, short, params, alpha):
    """ConvLinear + (out*alpha + shortcut) + ReLU, no HBM concat."""
    wt, g, be, mu, var = params                    # wt: (1,1,Cc,Cout)
    cc, cout = int(wt.shape[2]), int(wt.shape[3])
    c = cc // 3
    n, h, w, _ = b0.shape
    sc, bi = _fold_bn(g, be, mu, var)
    w2d = wt.reshape(cc, cout).astype(jnp.bfloat16)
    w0, w1, w2 = w2d[:c], w2d[c:2 * c], w2d[2 * c:]

    kernel = functools.partial(_tail_kernel, alpha=alpha)
    flops = 2 * n * h * w * cc * cout
    bytes_acc = (2 * (3 * n * h * w * c + n * h * w * cout + cc * cout)
                 + 8 * cout + 4 * n * h * w * cout)
    return pl.pallas_call(
        kernel,
        out_shape=jax.ShapeDtypeStruct((n, h, w, cout), jnp.float32),
        grid=(n,),
        in_specs=[
            pl.BlockSpec((1, h, w, c), lambda i: (i, 0, 0, 0)),
            pl.BlockSpec((1, h, w, c), lambda i: (i, 0, 0, 0)),
            pl.BlockSpec((1, h, w, c), lambda i: (i, 0, 0, 0)),
            pl.BlockSpec((1, h, w, cout), lambda i: (i, 0, 0, 0)),
            pl.BlockSpec((c, cout), lambda i: (0, 0)),
            pl.BlockSpec((c, cout), lambda i: (0, 0)),
            pl.BlockSpec((c, cout), lambda i: (0, 0)),
            pl.BlockSpec((1, cout), lambda i: (0, 0)),
            pl.BlockSpec((1, cout), lambda i: (0, 0)),
        ],
        out_specs=pl.BlockSpec((1, h, w, cout), lambda i: (i, 0, 0, 0)),
        compiler_params=pltpu.CompilerParams(dimension_semantics=("parallel",)),
        cost_estimate=pl.CostEstimate(flops=flops, transcendentals=0,
                                      bytes_accessed=bytes_acc),
    )(b0, b1, b2, short, w0, w1, w2, sc.reshape(1, cout), bi.reshape(1, cout))


# ----------------------------------------------------------------------------
# BasicRFB forward (stride=1, groups=1, vision=1, scale=0.1)
# ----------------------------------------------------------------------------
def basic_rfb_forward(x_nchw, params, scale=0.1):
    # TODO(synk): the NCHW<->NHWC transposes stay on the host; fusing them into
    # the first/last kernels would save two full HBM passes.
    x = jnp.transpose(x_nchw, (0, 2, 3, 1)).astype(jnp.bfloat16)   # NCHW -> NHWC

    # Fused 1x1 heads (branch0/1/2 first convs + shortcut), one read of x.
    b0, b1, b2, short = stem_1x1(
        x, [params["b0_0"], params["b1_0"], params["b2_0"], params["shortcut"]])

    # branch0: 3x3 p1 (relu) -> 3x3 p2 d2 (no relu)
    b0 = conv3x3_bn(b0, params["b0_1"], padding=1, dilation=1, relu=True)
    b0 = conv3x3_bn(b0, params["b0_2"], padding=2, dilation=2, relu=False)

    # branch1: 3x3 p1 (relu) -> 3x3 p3 d3 (no relu)
    b1 = conv3x3_bn(b1, params["b1_1"], padding=1, dilation=1, relu=True)
    b1 = conv3x3_bn(b1, params["b1_2"], padding=3, dilation=3, relu=False)

    # branch2: 3x3 p1 (relu) -> 3x3 p1 (relu) -> 3x3 p5 d5 (no relu)
    b2 = conv3x3_bn(b2, params["b2_1"], padding=1, dilation=1, relu=True)
    b2 = conv3x3_bn(b2, params["b2_2"], padding=1, dilation=1, relu=True)
    b2 = conv3x3_bn(b2, params["b2_3"], padding=5, dilation=5, relu=False)

    # ConvLinear on the virtual concat + out*scale + shortcut + ReLU (fused).
    out = conv_linear_tail(b0, b1, b2, short, params["conv_linear"], scale)

    return jnp.transpose(out, (0, 3, 1, 2))        # NHWC -> NCHW (match PyTorch)


# ----------------------------------------------------------------------------
# Plain-JAX reference (mirrors the bf16-matmul / fp32-accumulate policy)
# ----------------------------------------------------------------------------
def _ref_conv_bn(x, params, padding, dilation, relu, out_bf16=True):
    wt, g, be, mu, var = params
    y = lax.conv_general_dilated(
        x.astype(jnp.bfloat16), wt.astype(jnp.bfloat16), window_strides=(1, 1),
        padding=[(padding, padding), (padding, padding)],
        rhs_dilation=(dilation, dilation),
        dimension_numbers=("NHWC", "HWIO", "NHWC"),
        preferred_element_type=jnp.float32)
    scale, bias = _fold_bn(g, be, mu, var)
    y = y * scale + bias
    if relu:
        y = jnp.maximum(y, 0.0)
    return y.astype(jnp.bfloat16) if out_bf16 else y


def basic_rfb_reference(x_nchw, params, scale=0.1):
    x = jnp.transpose(x_nchw, (0, 2, 3, 1)).astype(jnp.bfloat16)
    b0 = _ref_conv_bn(x,  params["b0_0"], 0, 1, False)
    b0 = _ref_conv_bn(b0, params["b0_1"], 1, 1, True)
    b0 = _ref_conv_bn(b0, params["b0_2"], 2, 2, False)
    b1 = _ref_conv_bn(x,  params["b1_0"], 0, 1, False)
    b1 = _ref_conv_bn(b1, params["b1_1"], 1, 1, True)
    b1 = _ref_conv_bn(b1, params["b1_2"], 3, 3, False)
    b2 = _ref_conv_bn(x,  params["b2_0"], 0, 1, False)
    b2 = _ref_conv_bn(b2, params["b2_1"], 1, 1, True)
    b2 = _ref_conv_bn(b2, params["b2_2"], 1, 1, True)
    b2 = _ref_conv_bn(b2, params["b2_3"], 5, 5, False)
    cat = jnp.concatenate([b0, b1, b2], axis=-1)
    lin = _ref_conv_bn(cat, params["conv_linear"], 0, 1, False, out_bf16=False)
    short = _ref_conv_bn(x, params["shortcut"], 0, 1, False).astype(jnp.float32)
    out = jnp.maximum(lin * scale + short, 0.0)
    return jnp.transpose(out, (0, 3, 1, 2))


# ----------------------------------------------------------------------------
# Deterministic parameter init (shapes from BasicRFB.__init__)
# ----------------------------------------------------------------------------
def _make_conv_params(key, kh, kw, cin, cout):
    k1, k2, k3, k4, k5 = jax.random.split(key, 5)
    fan_in = kh * kw * cin
    w = jax.random.normal(k1, (kh, kw, cin, cout), jnp.float32) * (2.0 / fan_in) ** 0.5
    gamma = 1.0 + 0.1 * jax.random.normal(k2, (cout,), jnp.float32)
    beta = 0.1 * jax.random.normal(k3, (cout,), jnp.float32)
    mean = 0.1 * jax.random.normal(k4, (cout,), jnp.float32)
    var = 1.0 + 0.1 * jax.random.uniform(k5, (cout,), jnp.float32)
    return (w, gamma, beta, mean, var)


def init_params(key, in_planes, out_planes, map_reduce=8):
    inter = in_planes // map_reduce
    keys = jax.random.split(key, 12)
    p = {}
    p["b0_0"] = _make_conv_params(keys[0], 1, 1, in_planes, inter)
    p["b0_1"] = _make_conv_params(keys[1], 3, 3, inter, 2 * inter)
    p["b0_2"] = _make_conv_params(keys[2], 3, 3, 2 * inter, 2 * inter)
    p["b1_0"] = _make_conv_params(keys[3], 1, 1, in_planes, inter)
    p["b1_1"] = _make_conv_params(keys[4], 3, 3, inter, 2 * inter)
    p["b1_2"] = _make_conv_params(keys[5], 3, 3, 2 * inter, 2 * inter)
    p["b2_0"] = _make_conv_params(keys[6], 1, 1, in_planes, inter)
    p["b2_1"] = _make_conv_params(keys[7], 3, 3, inter, inter // 2 * 3)
    p["b2_2"] = _make_conv_params(keys[8], 3, 3, inter // 2 * 3, 2 * inter)
    p["b2_3"] = _make_conv_params(keys[9], 3, 3, 2 * inter, 2 * inter)
    p["conv_linear"] = _make_conv_params(keys[10], 1, 1, 6 * inter, out_planes)
    p["shortcut"] = _make_conv_params(keys[11], 1, 1, in_planes, out_planes)
    return p


if __name__ == "__main__":
    key = jax.random.PRNGKey(0)
    kx, kp = jax.random.split(key)

    in_planes, out_planes = 16, 16          # inter_planes = 2
    N, H, W = 2, 16, 16
    x = jax.random.normal(kx, (N, in_planes, H, W), jnp.float32)   # NCHW like PyTorch

    params = init_params(kp, in_planes, out_planes)

    out = jax.block_until_ready(basic_rfb_forward(x, params, scale=0.1))
    ref = jax.block_until_ready(basic_rfb_reference(x, params, scale=0.1))

    assert out.shape == (N, out_planes, H, W), out.shape
    np.testing.assert_allclose(np.asarray(out), np.asarray(ref), rtol=1e-2, atol=1e-2)
    print("KERNEL_OK")
</pallas_src>

<mosaic_0001>
module attributes {stable_mosaic.version = 11 : i64} {
  func.func @_stem_kernel(%arg0: i32, %arg1: memref<1x16x16x16xbf16, #tpu.memory_space<vmem>>, %arg2: memref<16x22xbf16, #tpu.memory_space<vmem>>, %arg3: memref<1x22xf32, #tpu.memory_space<vmem>>, %arg4: memref<1x22xf32, #tpu.memory_space<vmem>>, %arg5: memref<1x16x16x2xbf16, #tpu.memory_space<vmem>>, %arg6: memref<1x16x16x2xbf16, #tpu.memory_space<vmem>>, %arg7: memref<1x16x16x2xbf16, #tpu.memory_space<vmem>>, %arg8: memref<1x16x16x16xbf16, #tpu.memory_space<vmem>>) attributes {dimension_semantics = [#tpu.dimension_semantics<parallel>], iteration_bounds = array<i64: 2>, scalar_prefetch = 0 : i64, scratch_operands = 0 : i64, tpu.core_type = #tpu.core_type<tc>, window_params = [{transform_indices = @transform_0, window_bounds = array<i64: 1, 16, 16, 16>}, {pipeline_mode = #tpu.pipeline_mode<synchronous>, transform_indices = @transform_1, window_bounds = array<i64: 16, 22>}, {pipeline_mode = #tpu.pipeline_mode<synchronous>, transform_indices = @transform_2, window_bounds = array<i64: 1, 22>}, {pipeline_mode = #tpu.pipeline_mode<synchronous>, transform_indices = @transform_3, window_bounds = array<i64: 1, 22>}, {transform_indices = @transform_4, window_bounds = array<i64: 1, 16, 16, 2>}, {transform_indices = @transform_5, window_bounds = array<i64: 1, 16, 16, 2>}, {transform_indices = @transform_6, window_bounds = array<i64: 1, 16, 16, 2>}, {transform_indices = @transform_7, window_bounds = array<i64: 1, 16, 16, 16>}]} {
    %c0 = arith.constant 0 : index
    %c0_0 = arith.constant 0 : index
    %c0_1 = arith.constant 0 : index
    %c0_2 = arith.constant 0 : index
    %0 = vector.load %arg1[%c0, %c0_0, %c0_1, %c0_2] : memref<1x16x16x16xbf16, #tpu.memory_space<vmem>>, vector<1x16x16x16xbf16>
    %1 = vector.shape_cast %0 : vector<1x16x16x16xbf16> to vector<16x16x16xbf16>
    %2 = vector.shape_cast %1 : vector<16x16x16xbf16> to vector<256x16xbf16>
    %c0_3 = arith.constant 0 : index
    %c0_4 = arith.constant 0 : index
    %3 = vector.load %arg2[%c0_3, %c0_4] : memref<16x22xbf16, #tpu.memory_space<vmem>>, vector<16x22xbf16>
    %cst = arith.constant dense<0.000000e+00> : vector<256x22xf32>
    %4 = tpu.matmul %2, %3, %cst {dimension_numbers = #tpu.dot_dimension_numbers<[1], [0], [0], [1], [0, 0, 1, 1], [], []>} : vector<256x16xbf16>, vector<16x22xbf16>, vector<256x22xf32> -> vector<256x22xf32>
    %c0_5 = arith.constant 0 : index
    %c0_6 = arith.constant 0 : index
    %5 = vector.load %arg3[%c0_5, %c0_6] : memref<1x22xf32, #tpu.memory_space<vmem>>, vector<1x22xf32>
    %6 = vector.broadcast %5 : vector<1x22xf32> to vector<256x22xf32>
    %7 = arith.mulf %4, %6 : vector<256x22xf32>
    %c0_7 = arith.constant 0 : index
    %c0_8 = arith.constant 0 : index
    %8 = vector.load %arg4[%c0_7, %c0_8] : memref<1x22xf32, #tpu.memory_space<vmem>>, vector<1x22xf32>
    %9 = vector.broadcast %8 : vector<1x22xf32> to vector<256x22xf32>
    %10 = arith.addf %7, %9 : vector<256x22xf32>
    %11 = vector.extract_strided_slice %10 {offsets = [0, 0], sizes = [256, 2], strides = [1, 1]} : vector<256x22xf32> to vector<256x2xf32>
    %12 = arith.truncf %11 : vector<256x2xf32> to vector<256x2xbf16>
    %13 = vector.shape_cast %12 : vector<256x2xbf16> to vector<1x16x16x2xbf16>
    %c0_9 = arith.constant 0 : index
    %c0_10 = arith.constant 0 : index
    %c0_11 = arith.constant 0 : index
    %c0_12 = arith.constant 0 : index
    %14 = vector.load %arg5[%c0_9, %c0_10, %c0_11, %c0_12] : memref<1x16x16x2xbf16, #tpu.memory_space<vmem>>, vector<1x16x16x2xbf16>
    tpu.vector_store %arg5[%c0_9, %c0_10, %c0_11, %c0_12], %13 {strides = array<i32>} : memref<1x16x16x2xbf16, #tpu.memory_space<vmem>>, vector<1x16x16x2xbf16>,
    %15 = vector.extract_strided_slice %10 {offsets = [0, 2], sizes = [256, 2], strides = [1, 1]} : vector<256x22xf32> to vector<256x2xf32>
    %16 = arith.truncf %15 : vector<256x2xf32> to vector<256x2xbf16>
    %17 = vector.shape_cast %16 : vector<256x2xbf16> to vector<1x16x16x2xbf16>
    %c0_13 = arith.constant 0 : index
    %c0_14 = arith.constant 0 : index
    %c0_15 = arith.constant 0 : index
    %c0_16 = arith.constant 0 : index
    %18 = vector.load %arg6[%c0_13, %c0_14, %c0_15, %c0_16] : memref<1x16x16x2xbf16, #tpu.memory_space<vmem>>, vector<1x16x16x2xbf16>
    tpu.vector_store %arg6[%c0_13, %c0_14, %c0_15, %c0_16], %17 {strides = array<i32>} : memref<1x16x16x2xbf16, #tpu.memory_space<vmem>>, vector<1x16x16x2xbf16>,
    %19 = vector.extract_strided_slice %10 {offsets = [0, 4], sizes = [256, 2], strides = [1, 1]} : vector<256x22xf32> to vector<256x2xf32>
    %20 = arith.truncf %19 : vector<256x2xf32> to vector<256x2xbf16>
    %21 = vector.shape_cast %20 : vector<256x2xbf16> to vector<1x16x16x2xbf16>
    %c0_17 = arith.constant 0 : index
    %c0_18 = arith.constant 0 : index
    %c0_19 = arith.constant 0 : index
    %c0_20 = arith.constant 0 : index
    %22 = vector.load %arg7[%c0_17, %c0_18, %c0_19, %c0_20] : memref<1x16x16x2xbf16, #tpu.memory_space<vmem>>, vector<1x16x16x2xbf16>
    tpu.vector_store %arg7[%c0_17, %c0_18, %c0_19, %c0_20], %21 {strides = array<i32>} : memref<1x16x16x2xbf16, #tpu.memory_space<vmem>>, vector<1x16x16x2xbf16>,
    %23 = vector.extract_strided_slice %10 {offsets = [0, 6], sizes = [256, 16], strides = [1, 1]} : vector<256x22xf32> to vector<256x16xf32>
    %24 = arith.truncf %23 : vector<256x16xf32> to vector<256x16xbf16>
    %25 = vector.shape_cast %24 : vector<256x16xbf16> to vector<1x16x16x16xbf16>
    %c0_21 = arith.constant 0 : index
    %c0_22 = arith.constant 0 : index
    %c0_23 = arith.constant 0 : index
    %c0_24 = arith.constant 0 : index
    %26 = vector.load %arg8[%c0_21, %c0_22, %c0_23, %c0_24] : memref<1x16x16x16xbf16, #tpu.memory_space<vmem>>, vector<1x16x16x16xbf16>
    tpu.vector_store %arg8[%c0_21, %c0_22, %c0_23, %c0_24], %25 {strides = array<i32>} : memref<1x16x16x16xbf16, #tpu.memory_space<vmem>>, vector<1x16x16x16xbf16>,
    return
  }
  func.func @transform_0(%arg0: i32) -> (i32, i32, i32, i32) {
    %c0_i32 = arith.constant 0 : i32
    %c0_i32_0 = arith.constant 0 : i32
    %c0_i32_1 = arith.constant 0 : i32
    %c0_i32_2 = arith.constant 0 : i32
    return %arg0, %c0_i32, %c0_i32_0, %c0_i32_1 : i32, i32, i32, i32
  }
  func.func @transform_1(%arg0: i32) -> (i32, i32) {
    %c0_i32 = arith.constant 0 : i32
    %c0_i32_0 = arith.constant 0 : i32
    %c0_i32_1 = arith.constant 0 : i32
    return %c0_i32, %c0_i32_0 : i32, i32
  }
  func.func @transform_2(%arg0: i32) -> (i32, i32) {
    %c0_i32 = arith.constant 0 : i32
    %c0_i32_0 = arith.constant 0 : i32
    %c0_i32_1 = arith.constant 0 : i32
    return %c0_i32, %c0_i32_0 : i32, i32
  }
  func.func @transform_3(%arg0: i32) -> (i32, i32) {
    %c0_i32 = arith.constant 0 : i32
    %c0_i32_0 = arith.constant 0 : i32
    %c0_i32_1 = arith.constant 0 : i32
    return %c0_i32, %c0_i32_0 : i32, i32
  }
  func.func @transform_4(%arg0: i32) -> (i32, i32, i32, i32) {
    %c0_i32 = arith.constant 0 : i32
    %c0_i32_0 = arith.constant 0 : i32
    %c0_i32_1 = arith.constant 0 : i32
    %c0_i32_2 = arith.constant 0 : i32
    return %arg0, %c0_i32, %c0_i32_0, %c0_i32_1 : i32, i32, i32, i32
  }
  func.func @transform_5(%arg0: i32) -> (i32, i32, i32, i32) {
    %c0_i32 = arith.constant 0 : i32
    %c0_i32_0 = arith.constant 0 : i32
    %c0_i32_1 = arith.constant 0 : i32
    %c0_i32_2 = arith.constant 0 : i32
    return %arg0, %c0_i32, %c0_i32_0, %c0_i32_1 : i32, i32, i32, i32
  }
  func.func @transform_6(%arg0: i32) -> (i32, i32, i32, i32) {
    %c0_i32 = arith.constant 0 : i32
    %c0_i32_0 = arith.constant 0 : i32
    %c0_i32_1 = arith.constant 0 : i32
    %c0_i32_2 = arith.constant 0 : i32
    return %arg0, %c0_i32, %c0_i32_0, %c0_i32_1 : i32, i32, i32, i32
  }
  func.func @transform_7(%arg0: i32) -> (i32, i32, i32, i32) {
    %c0_i32 = arith.constant 0 : i32
    %c0_i32_0 = arith.constant 0 : i32
    %c0_i32_1 = arith.constant 0 : i32
    %c0_i32_2 = arith.constant 0 : i32
    return %arg0, %c0_i32, %c0_i32_0, %c0_i32_1 : i32, i32, i32, i32
  }
}

</mosaic_0001>

<bundles_post_ra>
// kernel: tpu_custom_call.1
= control target key start
LH: loop header
LB: loop body
LE: loop exit
PB: predicated region body
PF: predicated region fallthrough
CT: control target
= control target key end

     0   :  { %13 = vsyncpa [#allocation3], 0  ;;  %s2828_s0 = inlined_call_operand.hbm [shape: bf16[2,16,16,16], index: 0, kind: input, shape index: {}]   ;;  %s2829_s1 = inlined_call_operand.hbm [shape: bf16[16,22], index: 1, kind: input, shape index: {}]   ;;  %s2830_s2 = inlined_call_operand.vmem [shape: f32[1,22], index: 2, kind: input, shape index: {}]   ;;  %s2831_s3 = inlined_call_operand.vmem [shape: f32[1,22], index: 3, kind: input, shape index: {}]   ;;  %s2832_s4 = inlined_call_operand.vmem [shape: bf16[2,16,16,2], index: 4, kind: output, shape index: {0}]   ;;  %s2833_s5 = inlined_call_operand.vmem [shape: bf16[2,16,16,2], index: 5, kind: output, shape index: {1}]   ;;  %s2834_s6 = inlined_call_operand.vmem [shape: bf16[2,16,16,2], index: 6, kind: output, shape index: {2}]   ;;  %s2835_s7 = inlined_call_operand.hbm [shape: bf16[2,16,16,16], index: 7, kind: output, shape index: {3}]  }
   0x1   :  { %15 = vsyncpa [#allocation3 + $0x1], 0 }
   0x2   :  { %16 = vsyncpa [#allocation6], 0 }
   0x3   :  { %17 = vsyncpa [#allocation4], 0 }
   0x4   :  { %19 = vsyncpa [#allocation4 + $0x1], 0  ;;  %s1940_s24 = smov 0   ;;  %s1942_s25 = smov 0  }
   0x5   :  { %s1944_s26 = smov 0   ;;  %s1946_s27 = smov 0  }
   0x6 LB: > { %s1961_s28 = sadd.s32 4294967295, %s1888_s27   ;;  %s1500_s29 = sadd.s32 4294967294, %s1888_s27   ;;  %s1888_s27 = sphi %s1946_s27, %s2857_s27   ;;  %s1884_s26 = sphi %s1944_s26, %s2856_s26   ;;  %s1880_s25 = sphi %s1942_s25, %s2855_s25   ;;  %s1876_s24 = sphi %s1940_s24, %s2854_s24  }
   0x7   : > { %p45_p0 = scmp.ne.s32.totalorder %s1880_s25, %s1876_s24  ;;  %p2836_p1 = scmp.eq.s32.totalorder %s1961_s28, 0 }
   0x8   : > { %p216_p3 = scmp.eq.s32.totalorder %s1500_s29, 1  ;;  %p1501_p5 = scmp.ge.s32.totalorder %s1888_s27, 1 }
   0x9   : > { %p1970_p4 = por %p2836_p1, %p45_p0  ;;  %p223_p7 = scmp.lt.s32.totalorder %s1888_s27, 3 }
   0xa   : > { %p1975_p6 = por %p216_p3, %p45_p0  ;;  %s1890_s10 = smov [#allocation5]  }
   0xb   : > { %s2840_s30 = scalar_select %p1970_p4, 1, 0 }
   0xc   : > { %s2841_s8 = scalar_select %p1975_p6, 1, 0 }
   0xd   : > { %p1980_p8 = pnand %p1501_p5, %p223_p7  ;;  %s235_s11 = sshll.u32 %s1890_s10, 4  ;;  %s1984_s11 = int_to_ptr.vmem [resolvable:$true] %s235_s11 }
   0xe   : > { %s1996_s13 = sadd.s32 1, %s1888_s27   ;;  %s32_s14 = sadd.s32 1, %s1884_s26 }
   0xf   : > { %s2842_s9 = scalar_select %p1980_p8, 1, 0 }
  0x10   : > { %p1687_p9 = pneg %p1980_p8  ;;  %s29_s15 = ssub.s32 %s1888_s27, %s1996_s13 }
  0x11   : > { %s1760_s18 = scalar_lea.hbm %s2829_s1, 128 }
  0x12   : > { %p1991_p11 = pnand %p1687_p9, %p2836_p1  ;;  %p1761_p12 = scmp.ne.s32.totalorder %s2829_s1, %s1760_s18 }
  0x13   : > { %p1767_p5 = scmp.lt.u32.totalorder %s1760_s18, %s2829_s1 }
  0x14   : > { %p1762_p13 = pneg %p1991_p11 }
  0x16   : > { %p1763_p0 = pnand %p1762_p13, %p1761_p12 }
  0x18   : > { %p1764_p3 = pneg %p1763_p0 }
  0x1a   : > { %p1769_p7 = pnand %p1767_p5, %p1764_p3 }
  0x1c   : > { %1772 = shalt.err (!%p1769_p7)
}
  0x1d   : > { %s1773_s23 = scalar_lea.vmem %s1984_s11, 128  ;;  %p1781_p2 = scmp.lt.s32.totalorder %s1984_s11, %s1984_s11 }
  0x1e   : > { %p1774_p9 = scmp.ne.s32.totalorder %s1984_s11, %s1773_s23  ;;  %p1782_p6 = scmp.lt.s32.totalorder %s1773_s23, %s1773_s23 }
  0x20   : > { %p1776_p10 = pnand %p1774_p9, %p1762_p13  ;;  %p1783_p4 = por %p1782_p6, %p1781_p2 }
  0x22   : > { %p1777_p1 = pneg %p1776_p10 }
  0x24   : > { %p1784_p8 = pnand %p1783_p4, %p1777_p1 }
  0x26   : > { %1787 = shalt.err (!%p1784_p8)
}
  0x27   : > { %s2839_s29 = smov 64   ;;  %s1892_s10 = smov 4  }
  0x28   : > { %1690 = dma.hbm_to_vmem [thread:$0]  (!%p1991_p11), %s2829_s1, 128, %s1984_s11, [#allocation6], %s2839_s29, %s2839_s29, %s1892_s10  }
  0x29   : > { %p30_p1 = scmp.eq.s32.totalorder %s29_s15, 0  ;;  %p39_p2 = scmp.ne.s32.totalorder %s1884_s26, %s1880_s25 }
  0x2a   : > { %p40_p4 = scmp.eq.s32.totalorder %s1888_s27, 0  ;;  %p1700_p6 = scmp.lt.s32.totalorder %s1888_s27, 2 }
  0x2b   : > { %s2030_s18 = scalar_select %p30_p1, %s1884_s26, %s32_s14  }
  0x2c   : > { %p41_p8 = por %p40_p4, %p39_p2  ;;  %p2844_p10 = scmp.eq.s32.totalorder %s1961_s28, 1 }
  0x2d   : > { %s255_s12 = sand.u32 1, %s1884_s26   ;;  %s1589_s20 = sshll.u32 %s1888_s27, 11 }
  0x2e   : > { %p2034_p12 = por %p2844_p10, %p39_p2  ;;  %s1504_s21 = sshll.u32 %s255_s12, 7 }
  0x2f   : > { %s2043_s16 = scalar_lea.hbm %s2828_s0, %s1589_s20  ;;  %s259_s11 = scalar_lea.vmem [#allocation2], %s1504_s21 }
  0x30   : > { %s266_s14 = sshll.u32 %s259_s11, 4  ;;  %p2045_p11 = pnand %p1700_p6, %p41_p8  ;;  %s2049_s14 = int_to_ptr.vmem [resolvable:$true] %s266_s14 }
  0x31   : > { %s2051_s17 = scalar_lea.sflag [#allocation3], %s255_s12  ;;  %s1788_s29 = scalar_lea.hbm %s2043_s16, 2048 }
  0x32   : > { %p1789_p13 = scmp.ne.s32.totalorder %s2043_s16, %s1788_s29  ;;  %p1790_p0 = pneg %p2045_p11 }
  0x33   : > { %s1793_s22 = scalar_lea.hbm %s2828_s0, 4096  ;;  %p1794_p7 = scmp.lt.u32.totalorder %s2043_s16, %s2828_s0 }
  0x34   : > { %p1791_p3 = pnand %p1790_p0, %p1789_p13  ;;  %p1795_p9 = scmp.lt.u32.totalorder %s1793_s22, %s1788_s29 }
  0x35   : > { %p1797_p2 = scmp.lt.u32.totalorder %s1788_s29, %s2043_s16 }
  0x36   : > { %p1792_p5 = pneg %p1791_p3  ;;  %p1796_p1 = por %p1795_p9, %p1794_p7 }
  0x38   : > { %p1798_p4 = por %p1797_p2, %p1796_p1 }
  0x3a   : > { %p1799_p6 = pnand %p1798_p4, %p1792_p5 }
  0x3c   : > { %1802 = shalt.err (!%p1799_p6)
}
  0x3d   : > { %s1803_s12 = scalar_lea.vmem %s2049_s14, 2048  ;;  %s1893_s20 = smov [#allocation2]  }
  0x3e   : > { %p1804_p8 = scmp.ne.s32.totalorder %s2049_s14, %s1803_s12  ;;  %s1808_s21 = sshll.u32 %s1893_s20, 4  ;;  %s1809_s21 = int_to_ptr.vmem [resolvable:$false] %s1808_s21 }
  0x3f   : > { %s1810_s23 = scalar_lea.vmem %s1809_s21, 4096  ;;  %p1811_p3 = scmp.lt.s32.totalorder %s2049_s14, %s1809_s21 }
  0x40   : > { %p1806_p10 = pnand %p1804_p8, %p1790_p0  ;;  %p1812_p7 = scmp.lt.s32.totalorder %s1810_s23, %s1803_s12 }
  0x42   : > { %p1807_p13 = pneg %p1806_p10  ;;  %p1813_p9 = por %p1812_p7, %p1811_p3 }
  0x44   : > { %p1814_p1 = pnand %p1813_p9, %p1807_p13 }
  0x46   : > { %1817 = shalt.err (!%p1814_p1)
}
  0x47   : > { %s2847_s29 = smov 64   ;;  %p2848_p0 = scmp.ne.s32.totalorder %s2842_s9, 0 }
  0x48   : > { %1694 = dma.hbm_to_vmem [thread:$0]  (!%p2045_p11), %s2043_s16, 2048, %s2049_s14, %s2051_s17, %s2847_s29, %s2847_s29, %s1892_s10  }
  0x49   : > { %278 = sbr.rel (%p2848_p0) target bundleno = 625 (0x271), region = 36  ;;  %s2085_s22 = sand.u32 (!%p2848_p0), 1, %s1880_s25  }
  0x4a   : > { %s1508_s11 = sshll.u32 (!%p2848_p0), %s2085_s22, 7  ;;  %s281_s12 = scalar_lea.sflag (!%p2848_p0), [#allocation3], %s2085_s22 }
  0x4b   : > { %s2091_s15 = scalar_lea.vmem (!%p2848_p0), [#allocation2], %s1508_s11  ;;  %p2849_p5 = scmp.ne.s32.totalorder (!%p2848_p0), %s2840_s30, 0 }
  0x50   : > { %1863 = dma.done.wait (%p2849_p5), %s281_s12, 2048  }
  0x51   : > { %1865 = vsyncadd (%p2849_p5), %s281_s12, 4294965248  ;;  %p2850_p11 = scmp.eq.s32.totalorder %s1961_s28, 0 }
  0x53   : > { %1867 = dma.done.wait (%p2850_p11), [#allocation6], 128   ;;  %p2851_p2 = pmov %p2850_p11 }
  0x54   : > { %v1743_v0 = vld [vmem:[#allocation5] sm:$0xff]   ;;  %vm470_vm0 = vcmask 130048   ;;  %v1746_v3 = vld [vmem:[%s2091_s15 + $0x8] sm:$0xff]   ;;  %v1748_v5 = vld [vmem:[%s2091_s15 + $0x10] sm:$0xff]   ;;  %p334_p4 = scmp.lt.s32.totalorder %s1961_s28, 1  ;;  %vm886_vm1 = vcmask 11264  }
  0x55   : > { %1869 = vsyncadd (%p2851_p2), [#allocation6], 4294967168  ;;  %v1744_v1 = vld [vmem:[%s2091_s15] sm:$0xff]   ;;  %1643 = vmatprep.subr.bf16.mxu0 %v1743_v0  ;;  %1677 = vmatprep.subr.bf16.mxu1 %v1743_v0  ;;  %v1747_v4 = vld [vmem:[%s2091_s15 + $0x48] sm:$0xff]   ;;  %s1894_s29 = smov 126   ;;  %s1895_s12 = smov 124  }
  0x56   : > { %v1745_v2 = vld [vmem:[%s2091_s15 + $0x40] sm:$0xff]   ;;  %1644 = vmatpush3.bf16.msra.mxu0 %v1743_v0  ;;  %1678 = vmatpush3.bf16.msra.mxu1 %v1743_v0  ;;  %v1750_v6 = vld [vmem:[%s2091_s15 + $0x50] sm:$0xff]   ;;  %v1749_v7 = vld [vmem:[%s2091_s15 + $0x18] sm:$0xff]   ;;  %s335_s30 = scalar_select %p334_p4, %s1961_s28, 1  ;;  %vm1271_vm2 = vcmask 125952  }
  0x57   : > { %1645 = vmatprep.mubr.msk.bf16.mxu0 %vm470_vm0, %v1744_v1  ;;  %1661 = vmatprep.mubr.msk.bf16.mxu1 %vm470_vm0, %v1745_v2  ;;  %v1751_v8 = vld [vmem:[%s2091_s15 + $0x58] sm:$0xff]   ;;  %v1752_v9 = vld [vmem:[%s2091_s15 + $0x20] sm:$0xff]   ;;  %v1753_v11 = vld [vmem:[%s2091_s15 + $0x28] sm:$0xff]  }
  0x58   : > { %v1754_v10 = vld [vmem:[%s2091_s15 + $0x60] sm:$0xff]   ;;  %v1755_v12 = vld [vmem:[%s2091_s15 + $0x68] sm:$0xff]   ;;  %v1756_v13 = vld [vmem:[%s2091_s15 + $0x30] sm:$0xff]   ;;  %s2145_s17 = sshll.u32 %s335_s30, 7  ;;  %s1897_s30 = smov [#allocation7]  }
  0x59   : > { %1646 = vmatmul.mubr.msk.bf16.vlgmr.msra.gmra.mrb[0].mxu0 %vm470_vm0, %v1746_v3  ;;  %1662 = vmatmul.mubr.msk.bf16.vlgmr.msra.gmra.mrb[0].mxu1 %vm470_vm0, %v1747_v4  ;;  %v1758_v14 = vld [vmem:[%s2091_s15 + $0x70] sm:$0xff]   ;;  %v1757_v15 = vld [vmem:[%s2091_s15 + $0x38] sm:$0xff]   ;;  %v2138_v17 = vld [vmem:[%s2830_s2] ss:$0 sm:$0xff]  ;;  %s2159_s23 = scalar_lea.vmem %s2832_s4, %s2145_s17  ;;  %s2497_s10 = scalar_lea.vmem %s2833_s5, %s2145_s17 }
  0x5a   : > { %1649 = vmatprep.mubr.msk.bf16.mxu0 %vm470_vm0, %v1748_v5  ;;  %1665 = vmatprep.mubr.msk.bf16.mxu1 %vm470_vm0, %v1750_v6  ;;  %v1759_v16 = vld [vmem:[%s2091_s15 + $0x78] sm:$0xff]   ;;  %v2143_v19 = vld [vmem:[%s2831_s3] ss:$0 sm:$0xff]  ;;  %s1896_s15 = smov 122   ;;  %s2511_s20 = scalar_lea.vmem %s2834_s6, %s2145_s17 }
  0x5b   : > { %s2531_s17 = scalar_lea.vmem [#allocation7], %s1508_s11  ;;  %s1625_s11 = sshll.u32 %s1961_s28, 11 }
  0x5c   : > { %s1342_s21 = sshll.u32 %s2531_s17, 4  ;;  %s1320_s28 = scalar_lea.sflag [#allocation4], %s2085_s22  ;;  %s2780_s21 = int_to_ptr.vmem [resolvable:$true] %s1342_s21 }
  0x5d   : > { %s1822_s9 = sshll.u32 %s1897_s30, 4  ;;  %s1823_s9 = int_to_ptr.vmem [resolvable:$false] %s1822_s9 }
  0x5e   : > { %p1825_p13 = scmp.lt.s32.totalorder %s2780_s21, %s1823_s9 }
  0x61   : > { %1650 = vmatmul.mubr.msk.bf16.gmra.mrb[4].mxu0 %vm470_vm0, %v1749_v7  ;;  %1666 = vmatmul.mubr.msk.bf16.gmra.mrb[4].mxu1 %vm470_vm0, %v1751_v8 }
  0x62   : > { %1653 = vmatprep.mubr.msk.bf16.mxu0 %vm470_vm0, %v1752_v9  ;;  %1669 = vmatprep.mubr.msk.bf16.mxu1 %vm470_vm0, %v1754_v10 }
  0x69   : > { %1654 = vmatmul.mubr.msk.bf16.gmra.mrb[8].mxu0 %vm470_vm0, %v1753_v11  ;;  %1670 = vmatmul.mubr.msk.bf16.gmra.mrb[8].mxu1 %vm470_vm0, %v1755_v12 }
  0x6a   : > { %1657 = vmatprep.mubr.msk.bf16.mxu0 %vm470_vm0, %v1756_v13  ;;  %1673 = vmatprep.mubr.msk.bf16.mxu1 %vm470_vm0, %v1758_v14 }
  0x71   : > { %1658 = vmatmul.mubr.msk.bf16.gmra.mrb[12].mxu0 %vm470_vm0, %v1757_v15  ;;  %1674 = vmatmul.mubr.msk.bf16.gmra.mrb[12].mxu1 %vm470_vm0, %v1759_v16 }
 0x12c   : > { %v1647_v18 = vpop.f32.mrb[0].mxu0  ;;  %v1663_v20 = vpop.f32.mrb[0].mxu1 }
 0x12d   : > { %v689_v21 = vmul.f32 %v1647_v18, %v2138_v17  ;;  %v705_v22 = vmul.f32 %v1663_v20, %v2138_v17  ;;  %v553_v23 = vpop.f32.mrb[1].mxu0  ;;  %v617_v24 = vpop.f32.mrb[1].mxu1 }
 0x12e   : > { %v687_v25 = vmul.f32 %v2138_v17, %v553_v23  ;;  %v703_v26 = vmul.f32 %v2138_v17, %v617_v24  ;;  %v1648_v27 = vpop.f32.mrb[2].mxu0  ;;  %v1664_v28 = vpop.f32.mrb[2].mxu1 }
 0x12f   : > { %v728_v29 = vadd.f32 %v2143_v19, %v689_v21  ;;  %v744_v30 = vadd.f32 %v2143_v19, %v705_v22  ;;  %v690_v31 = vmul.f32 %v1648_v27, %v2138_v17  ;;  %v706_v32 = vmul.f32 %v1664_v28, %v2138_v17  ;;  %v556_v33 = vpop.f32.mrb[3].mxu0  ;;  %v620_v34 = vpop.f32.mrb[3].mxu1 }
 0x130   : > { %v726_v35 = vadd.f32 %v2143_v19, %v687_v25  ;;  %v742_v36 = vadd.f32 %v2143_v19, %v703_v26  ;;  %v688_v37 = vmul.f32 %v2138_v17, %v556_v33  ;;  %v704_v38 = vmul.f32 %v2138_v17, %v620_v34 }
 0x131   : > { %v2165_v39 = vpack.c.bf16 %v728_v29, %v728_v29  ;;  %v2167_v40 = vpack.c.bf16 %v744_v30, %v744_v30  ;;  %v729_v41 = vadd.f32 %v2143_v19, %v690_v31  ;;  %v745_v42 = vadd.f32 %v2143_v19, %v706_v32 }
 0x132   : > { %v2171_v43 = vpack.c.bf16 %v726_v35, %v726_v35  ;;  %v2173_v44 = vpack.c.bf16 %v742_v36, %v742_v36  ;;  %v727_v45 = vadd.f32 %v2143_v19, %v688_v37  ;;  %v743_v46 = vadd.f32 %v2143_v19, %v704_v38 }
 0x133   : > { %889 = vst.msk [vmem:[%s2159_s23 + $0x8] sm:$0xf] %vm886_vm1, %v2165_v39  ;;  %905 = vst.msk [vmem:[%s2159_s23 + $0x48] sm:$0xf] %vm886_vm1, %v2167_v40  ;;  %v2183_v47 = vpack.c.bf16 %v729_v41, %v729_v41  ;;  %v2185_v48 = vpack.c.bf16 %v745_v42, %v745_v42  ;;  %955 = vrot.lane.b32.xlu0 %v2167_v40, %s1894_s29  ;;  %923 = vrot.lane.b32.xlu1 %v2165_v39, %s1894_s29 }
 0x134   : > { %887 = vst.msk [vmem:[%s2159_s23] sm:$0xf] %vm886_vm1, %v2171_v43  ;;  %903 = vst.msk [vmem:[%s2159_s23 + $0x40] sm:$0xf] %vm886_vm1, %v2173_v44  ;;  %v2197_v49 = vpack.c.bf16 %v727_v45, %v727_v45  ;;  %v2199_v50 = vpack.c.bf16 %v743_v46, %v743_v46  ;;  %v1651_v51 = vpop.f32.mrb[4].mxu0  ;;  %v1667_v52 = vpop.f32.mrb[4].mxu1 }
 0x135   : > { %890 = vst.msk [vmem:[%s2159_s23 + $0xc] sm:$0xf] %vm886_vm1, %v2183_v47  ;;  %906 = vst.msk [vmem:[%s2159_s23 + $0x4c] sm:$0xf] %vm886_vm1, %v2185_v48  ;;  %v693_v53 = vmul.f32 %v1651_v51, %v2138_v17  ;;  %v569_v54 = vpop.f32.mrb[5].mxu0  ;;  %v709_v55 = vmul.f32 %v1667_v52, %v2138_v17  ;;  %v633_v56 = vpop.f32.mrb[5].mxu1 }
 0x136   : > { %888 = vst.msk [vmem:[%s2159_s23 + $0x4] sm:$0xf] %vm886_vm1, %v2197_v49  ;;  %904 = vst.msk [vmem:[%s2159_s23 + $0x44] sm:$0xf] %vm886_vm1, %v2199_v50  ;;  %v691_v57 = vmul.f32 %v2138_v17, %v569_v54  ;;  %v1652_v58 = vpop.f32.mrb[6].mxu0  ;;  %v707_v59 = vmul.f32 %v2138_v17, %v633_v56  ;;  %v1668_v60 = vpop.f32.mrb[6].mxu1 }
 0x137   : > { %1051 = vrot.lane.b32.xlu0 %v2165_v39, %s1895_s12  ;;  %925 = vrot.lane.b32.xlu1 %v2183_v47, %s1894_s29  ;;  %v732_v61 = vadd.f32 %v2143_v19, %v693_v53  ;;  %v694_v62 = vmul.f32 %v1652_v58, %v2138_v17  ;;  %v572_v63 = vpop.f32.mrb[7].mxu0  ;;  %v748_v0 = vadd.f32 %v2143_v19, %v709_v55  ;;  %v636_v1 = vpop.f32.mrb[7].mxu1 }
 0x138   : > { %v730_v2 = vadd.f32 %v2143_v19, %v691_v57  ;;  %v692_v3 = vmul.f32 %v2138_v17, %v572_v63  ;;  %v746_v4 = vadd.f32 %v2143_v19, %v707_v59  ;;  %v710_v5 = vmul.f32 %v1668_v60, %v2138_v17 }
 0x139   : > { %v2228_v6 = vpack.c.bf16 %v732_v61, %v732_v61  ;;  %v733_v7 = vadd.f32 %v2143_v19, %v694_v62  ;;  %v2231_v8 = vpack.c.bf16 %v748_v0, %v748_v0  ;;  %v708_v9 = vmul.f32 %v2138_v17, %v636_v1 }
 0x13a   : > { %v2234_v10 = vpack.c.bf16 %v730_v2, %v730_v2  ;;  %v731_v11 = vadd.f32 %v2143_v19, %v692_v3  ;;  %v2237_v12 = vpack.c.bf16 %v746_v4, %v746_v4  ;;  %v749_v13 = vadd.f32 %v2143_v19, %v710_v5 }
 0x13b   : > { %1083 = vrot.lane.b32.xlu0 %v2167_v40, %s1895_s12  ;;  %957 = vrot.lane.b32.xlu1 %v2185_v48, %s1894_s29  ;;  %893 = vst.msk [vmem:[%s2159_s23 + $0x18] sm:$0xf] %vm886_vm1, %v2228_v6  ;;  %v2247_v14 = vpack.c.bf16 %v733_v7, %v733_v7  ;;  %909 = vst.msk [vmem:[%s2159_s23 + $0x58] sm:$0xf] %vm886_vm1, %v2231_v8  ;;  %v747_v15 = vadd.f32 %v2143_v19, %v708_v9 }
 0x13c   : > { %891 = vst.msk [vmem:[%s2159_s23 + $0x10] sm:$0xf] %vm886_vm1, %v2234_v10  ;;  %v2256_v16 = vpack.c.bf16 %v731_v11, %v731_v11  ;;  %907 = vst.msk [vmem:[%s2159_s23 + $0x50] sm:$0xf] %vm886_vm1, %v2237_v12  ;;  %v2261_v18 = vpack.c.bf16 %v749_v13, %v749_v13  ;;  %v1655_v20 = vpop.f32.mrb[8].mxu0  ;;  %v1671_v21 = vpop.f32.mrb[8].mxu1 }
 0x13d   : > { %894 = vst.msk [vmem:[%s2159_s23 + $0x1c] sm:$0xf] %vm886_vm1, %v2247_v14  ;;  %v2266_v22 = vpack.c.bf16 %v747_v15, %v747_v15  ;;  %v697_v23 = vmul.f32 %v1655_v20, %v2138_v17  ;;  %v585_v24 = vpop.f32.mrb[9].mxu0  ;;  %v713_v25 = vmul.f32 %v1671_v21, %v2138_v17  ;;  %v649_v26 = vpop.f32.mrb[9].mxu1 }
 0x13e   : > { %892 = vst.msk [vmem:[%s2159_s23 + $0x14] sm:$0xf] %vm886_vm1, %v2256_v16  ;;  %910 = vst.msk [vmem:[%s2159_s23 + $0x5c] sm:$0xf] %vm886_vm1, %v2261_v18  ;;  %v695_v27 = vmul.f32 %v2138_v17, %v585_v24  ;;  %v1656_v28 = vpop.f32.mrb[10].mxu0  ;;  %v711_v29 = vmul.f32 %v2138_v17, %v649_v26  ;;  %v1672_v30 = vpop.f32.mrb[10].mxu1 }
 0x13f   : > { %1179 = vrot.lane.b32.xlu0 %v2165_v39, %s1896_s15  ;;  %1053 = vrot.lane.b32.xlu1 %v2183_v47, %s1895_s12  ;;  %908 = vst.msk [vmem:[%s2159_s23 + $0x54] sm:$0xf] %vm886_vm1, %v2266_v22  ;;  %v736_v31 = vadd.f32 %v2143_v19, %v697_v23  ;;  %v698_v32 = vmul.f32 %v1656_v28, %v2138_v17  ;;  %v588_v33 = vpop.f32.mrb[11].mxu0  ;;  %v652_v35 = vpop.f32.mrb[11].mxu1 }
 0x140   : > { %v752_v34 = vadd.f32 %v2143_v19, %v713_v25  ;;  %v734_v36 = vadd.f32 %v2143_v19, %v695_v27  ;;  %v696_v37 = vmul.f32 %v2138_v17, %v588_v33  ;;  %v750_v38 = vadd.f32 %v2143_v19, %v711_v29 }
 0x141   : > { %v714_v39 = vmul.f32 %v1672_v30, %v2138_v17  ;;  %v2292_v41 = vpack.c.bf16 %v736_v31, %v736_v31  ;;  %v737_v42 = vadd.f32 %v2143_v19, %v698_v32  ;;  %v712_v46 = vmul.f32 %v2138_v17, %v652_v35 }
 0x142   : > { %v2295_v45 = vpack.c.bf16 %v752_v34, %v752_v34  ;;  %v2298_v51 = vpack.c.bf16 %v734_v36, %v734_v36  ;;  %v735_v52 = vadd.f32 %v2143_v19, %v696_v37  ;;  %v2301_v53 = vpack.c.bf16 %v750_v38, %v750_v38 }
 0x143   : > { %v753_v54 = vadd.f32 %v2143_v19, %v714_v39  ;;  %1211 = vrot.lane.b32.xlu0 %v2167_v40, %s1896_s15  ;;  %1085 = vrot.lane.b32.xlu1 %v2185_v48, %s1895_s12  ;;  %897 = vst.msk [vmem:[%s2159_s23 + $0x28] sm:$0xf] %vm886_vm1, %v2292_v41  ;;  %v2311_v55 = vpack.c.bf16 %v737_v42, %v737_v42 }
 0x144   : > { %913 = vst.msk [vmem:[%s2159_s23 + $0x68] sm:$0xf] %vm886_vm1, %v2295_v45  ;;  %v751_v56 = vadd.f32 %v2143_v19, %v712_v46  ;;  %895 = vst.msk [vmem:[%s2159_s23 + $0x20] sm:$0xf] %vm886_vm1, %v2298_v51  ;;  %v2320_v57 = vpack.c.bf16 %v735_v52, %v735_v52  ;;  %v1659_v58 = vpop.f32.mrb[12].mxu0  ;;  %v1675_v59 = vpop.f32.mrb[12].mxu1 }
 0x145   : > { %911 = vst.msk [vmem:[%s2159_s23 + $0x60] sm:$0xf] %vm886_vm1, %v2301_v53  ;;  %v2325_v40 = vpack.c.bf16 %v753_v54, %v753_v54  ;;  %898 = vst.msk [vmem:[%s2159_s23 + $0x2c] sm:$0xf] %vm886_vm1, %v2311_v55  ;;  %v701_v61 = vmul.f32 %v1659_v58, %v2138_v17  ;;  %v601_v62 = vpop.f32.mrb[13].mxu0  ;;  %v717_v63 = vmul.f32 %v1675_v59, %v2138_v17  ;;  %v665_v0 = vpop.f32.mrb[13].mxu1 }
 0x146   : > { %v2330_v60 = vpack.c.bf16 %v751_v56, %v751_v56  ;;  %896 = vst.msk [vmem:[%s2159_s23 + $0x24] sm:$0xf] %vm886_vm1, %v2320_v57  ;;  %v699_v1 = vmul.f32 %v2138_v17, %v601_v62  ;;  %v1660_v2 = vpop.f32.mrb[14].mxu0  ;;  %v715_v3 = vmul.f32 %v2138_v17, %v665_v0  ;;  %v1676_v4 = vpop.f32.mrb[14].mxu1 }
 0x147   : > { %914 = vst.msk [vmem:[%s2159_s23 + $0x6c] sm:$0xf] %vm886_vm1, %v2325_v40  ;;  %919 = vrot.lane.b32.xlu0 %v2171_v43, %s1894_s29  ;;  %1181 = vrot.lane.b32.xlu1 %v2183_v47, %s1896_s15  ;;  %v740_v5 = vadd.f32 %v2143_v19, %v701_v61  ;;  %v702_v7 = vmul.f32 %v1660_v2, %v2138_v17  ;;  %v604_v9 = vpop.f32.mrb[15].mxu0  ;;  %v668_v13 = vpop.f32.mrb[15].mxu1 }
 0x148   : > { %912 = vst.msk [vmem:[%s2159_s23 + $0x64] sm:$0xf] %vm886_vm1, %v2330_v60  ;;  %v756_v11 = vadd.f32 %v2143_v19, %v717_v63  ;;  %v738_v15 = vadd.f32 %v2143_v19, %v699_v1  ;;  %v700_v20 = vmul.f32 %v2138_v17, %v604_v9  ;;  %v754_v21 = vadd.f32 %v2143_v19, %v715_v3 }
 0x149   : > { %v718_v47 = vmul.f32 %v1676_v4, %v2138_v17  ;;  %v2356_v23 = vpack.c.bf16 %v740_v5, %v740_v5  ;;  %v741_v24 = vadd.f32 %v2143_v19, %v702_v7  ;;  %v716_v26 = vmul.f32 %v2138_v17, %v668_v13 }
 0x14a   : > { %v2359_v25 = vpack.c.bf16 %v756_v11, %v756_v11  ;;  %v2362_v27 = vpack.c.bf16 %v738_v15, %v738_v15  ;;  %v739_v28 = vadd.f32 %v2143_v19, %v700_v20  ;;  %v2365_v29 = vpack.c.bf16 %v754_v21, %v754_v21 }
 0x14b   : > { %v757_v30 = vadd.f32 %v2143_v19, %v718_v47  ;;  %951 = vrot.lane.b32.xlu0 %v2173_v44, %s1894_s29  ;;  %1213 = vrot.lane.b32.xlu1 %v2185_v48, %s1896_s15  ;;  %901 = vst.msk [vmem:[%s2159_s23 + $0x38] sm:$0xf] %vm886_vm1, %v2356_v23  ;;  %v2375_v17 = vpack.c.bf16 %v741_v24, %v741_v24 }
 0x14c   : > { %917 = vst.msk [vmem:[%s2159_s23 + $0x78] sm:$0xf] %vm886_vm1, %v2359_v25  ;;  %v755_v31 = vadd.f32 %v2143_v19, %v716_v26  ;;  %899 = vst.msk [vmem:[%s2159_s23 + $0x30] sm:$0xf] %vm886_vm1, %v2362_v27  ;;  %v2384_v32 = vpack.c.bf16 %v739_v28, %v739_v28 }
 0x14d   : > { %915 = vst.msk [vmem:[%s2159_s23 + $0x70] sm:$0xf] %vm886_vm1, %v2365_v29  ;;  %v2389_v33 = vpack.c.bf16 %v757_v30, %v757_v30  ;;  %902 = vst.msk [vmem:[%s2159_s23 + $0x3c] sm:$0xf] %vm886_vm1, %v2375_v17 }
 0x14e   : > { %v2394_v48 = vpack.c.bf16 %v755_v31, %v755_v31  ;;  %900 = vst.msk [vmem:[%s2159_s23 + $0x34] sm:$0xf] %vm886_vm1, %v2384_v32 }
 0x14f   : > { %918 = vst.msk [vmem:[%s2159_s23 + $0x7c] sm:$0xf] %vm886_vm1, %v2389_v33  ;;  %1047 = vrot.lane.b32.xlu0 %v2171_v43, %s1895_s12  ;;  %953 = vrot.lane.b32.xlu1 %v2199_v50, %s1894_s29 }
 0x150   : > { %916 = vst.msk [vmem:[%s2159_s23 + $0x74] sm:$0xf] %vm886_vm1, %v2394_v48 }
 0x153   : > { %1079 = vrot.lane.b32.xlu0 %v2173_v44, %s1895_s12  ;;  %1049 = vrot.lane.b32.xlu1 %v2197_v49, %s1895_s12 }
 0x157   : > { %1175 = vrot.lane.b32.xlu0 %v2171_v43, %s1896_s15  ;;  %1081 = vrot.lane.b32.xlu1 %v2199_v50, %s1895_s12 }
 0x15b   : > { %1207 = vrot.lane.b32.xlu0 %v2173_v44, %s1896_s15  ;;  %1177 = vrot.lane.b32.xlu1 %v2197_v49, %s1896_s15 }
 0x15f   : > { %1209 = vrot.lane.b32.xlu1 %v2199_v50, %s1896_s15  ;;  %921 = vrot.lane.b32.xlu0 %v2197_v49, %s1894_s29 }
 0x163   : > { %931 = vrot.lane.b32.xlu0 %v2228_v6, %s1894_s29  ;;  %933 = vrot.lane.b32.xlu1 %v2247_v14, %s1894_s29 }
 0x167   : > { %963 = vrot.lane.b32.xlu0 %v2231_v8, %s1894_s29  ;;  %965 = vrot.lane.b32.xlu1 %v2261_v18, %s1894_s29 }
 0x16b   : > { %1059 = vrot.lane.b32.xlu0 %v2228_v6, %s1895_s12  ;;  %1061 = vrot.lane.b32.xlu1 %v2247_v14, %s1895_s12 }
 0x16f   : > { %1091 = vrot.lane.b32.xlu0 %v2231_v8, %s1895_s12  ;;  %1093 = vrot.lane.b32.xlu1 %v2261_v18, %s1895_s12 }
 0x173   : > { %1187 = vrot.lane.b32.xlu0 %v2228_v6, %s1896_s15  ;;  %1189 = vrot.lane.b32.xlu1 %v2247_v14, %s1896_s15 }
 0x177   : > { %1219 = vrot.lane.b32.xlu0 %v2231_v8, %s1896_s15  ;;  %1221 = vrot.lane.b32.xlu1 %v2261_v18, %s1896_s15 }
 0x17b   : > { %927 = vrot.lane.b32.xlu0 %v2234_v10, %s1894_s29  ;;  %929 = vrot.lane.b32.xlu1 %v2256_v16, %s1894_s29 }
 0x17f   : > { %959 = vrot.lane.b32.xlu0 %v2237_v12, %s1894_s29  ;;  %961 = vrot.lane.b32.xlu1 %v2266_v22, %s1894_s29 }
 0x183   : > { %1055 = vrot.lane.b32.xlu0 %v2234_v10, %s1895_s12  ;;  %1057 = vrot.lane.b32.xlu1 %v2256_v16, %s1895_s12 }
 0x187   : > { %1087 = vrot.lane.b32.xlu0 %v2237_v12, %s1895_s12  ;;  %1089 = vrot.lane.b32.xlu1 %v2266_v22, %s1895_s12 }
 0x18b   : > { %1183 = vrot.lane.b32.xlu0 %v2234_v10, %s1896_s15  ;;  %1185 = vrot.lane.b32.xlu1 %v2256_v16, %s1896_s15 }
 0x18f   : > { %1215 = vrot.lane.b32.xlu0 %v2237_v12, %s1896_s15  ;;  %1217 = vrot.lane.b32.xlu1 %v2266_v22, %s1896_s15 }
 0x193   : > { %939 = vrot.lane.b32.xlu0 %v2292_v41, %s1894_s29  ;;  %941 = vrot.lane.b32.xlu1 %v2311_v55, %s1894_s29 }
 0x197   : > { %971 = vrot.lane.b32.xlu0 %v2295_v45, %s1894_s29  ;;  %973 = vrot.lane.b32.xlu1 %v2325_v40, %s1894_s29 }
 0x19b   : > { %1067 = vrot.lane.b32.xlu0 %v2292_v41, %s1895_s12  ;;  %1069 = vrot.lane.b32.xlu1 %v2311_v55, %s1895_s12 }
 0x19f   : > { %1099 = vrot.lane.b32.xlu0 %v2295_v45, %s1895_s12  ;;  %1101 = vrot.lane.b32.xlu1 %v2325_v40, %s1895_s12 }
 0x1a3   : > { %1195 = vrot.lane.b32.xlu0 %v2292_v41, %s1896_s15  ;;  %1197 = vrot.lane.b32.xlu1 %v2311_v55, %s1896_s15 }
 0x1a5   : > { %v956_v19 = vpop.permute.xlu0 %955  ;;  %v924_v43 = vpop.permute.xlu1 %923 }
 0x1a6   : > { %1033 = vst.msk [vmem:[%s2497_s10 + $0x48] sm:$0xf] %vm886_vm1, %v956_v19  ;;  %1017 = vst.msk [vmem:[%s2497_s10 + $0x8] sm:$0xf] %vm886_vm1, %v924_v43 }
 0x1a7   : > { %1227 = vrot.lane.b32.xlu0 %v2295_v45, %s1896_s15  ;;  %1229 = vrot.lane.b32.xlu1 %v2325_v40, %s1896_s15 }
 0x1a9   : > { %v1052_v44 = vpop.permute.xlu0 %1051  ;;  %v926_v49 = vpop.permute.xlu1 %925 }
 0x1aa   : > { %1145 = vst.msk [vmem:[%s2511_s20 + $0x8] sm:$0xf] %vm886_vm1, %v1052_v44  ;;  %1018 = vst.msk [vmem:[%s2497_s10 + $0xc] sm:$0xf] %vm886_vm1, %v926_v49 }
 0x1ab   : > { %935 = vrot.lane.b32.xlu0 %v2298_v51, %s1894_s29  ;;  %937 = vrot.lane.b32.xlu1 %v2320_v57, %s1894_s29 }
 0x1ad   : > { %v1084_v50 = vpop.permute.xlu0 %1083  ;;  %v958_v6 = vpop.permute.xlu1 %957 }
 0x1ae   : > { %1161 = vst.msk [vmem:[%s2511_s20 + $0x48] sm:$0xf] %vm886_vm1, %v1084_v50  ;;  %1034 = vst.msk [vmem:[%s2497_s10 + $0x4c] sm:$0xf] %vm886_vm1, %v958_v6 }
 0x1af   : > { %967 = vrot.lane.b32.xlu0 %v2301_v53, %s1894_s29  ;;  %969 = vrot.lane.b32.xlu1 %v2330_v60, %s1894_s29 }
 0x1b1   : > { %v1180_v8 = vpop.permute.xlu0 %1179  ;;  %v1054_v10 = vpop.permute.xlu1 %1053 }
 0x1b2   : > { %1274 = vst.msk [vmem:[%s2531_s17 + $0x8] sm:$0xf] %vm1271_vm2, %v1180_v8 }
 0x1b3   : > { %1146 = vst.msk [vmem:[%s2511_s20 + $0xc] sm:$0xf] %vm886_vm1, %v1054_v10  ;;  %1063 = vrot.lane.b32.xlu0 %v2298_v51, %s1895_s12  ;;  %1065 = vrot.lane.b32.xlu1 %v2320_v57, %s1895_s12 }
 0x1b5   : > { %v1212_v12 = vpop.permute.xlu0 %1211  ;;  %v1086_v14 = vpop.permute.xlu1 %1085 }
 0x1b6   : > { %1290 = vst.msk [vmem:[%s2531_s17 + $0x48] sm:$0xf] %vm1271_vm2, %v1212_v12 }
 0x1b7   : > { %1162 = vst.msk [vmem:[%s2511_s20 + $0x4c] sm:$0xf] %vm886_vm1, %v1086_v14  ;;  %1095 = vrot.lane.b32.xlu0 %v2301_v53, %s1895_s12  ;;  %1097 = vrot.lane.b32.xlu1 %v2330_v60, %s1895_s12 }
 0x1b9   : > { %v920_v16 = vpop.permute.xlu0 %919  ;;  %v1182_v18 = vpop.permute.xlu1 %1181 }
 0x1ba   : > { %1015 = vst.msk [vmem:[%s2497_s10] sm:$0xf] %vm886_vm1, %v920_v16 }
 0x1bb   : > { %1275 = vst.msk [vmem:[%s2531_s17 + $0xc] sm:$0xf] %vm1271_vm2, %v1182_v18  ;;  %1191 = vrot.lane.b32.xlu0 %v2298_v51, %s1896_s15  ;;  %1193 = vrot.lane.b32.xlu1 %v2320_v57, %s1896_s15 }
 0x1bd   : > { %v952_v22 = vpop.permute.xlu0 %951  ;;  %v1214_v34 = vpop.permute.xlu1 %1213 }
 0x1be   : > { %1031 = vst.msk [vmem:[%s2497_s10 + $0x40] sm:$0xf] %vm886_vm1, %v952_v22 }
 0x1bf   : > { %1291 = vst.msk [vmem:[%s2531_s17 + $0x4c] sm:$0xf] %vm1271_vm2, %v1214_v34  ;;  %1223 = vrot.lane.b32.xlu0 %v2301_v53, %s1896_s15  ;;  %1225 = vrot.lane.b32.xlu1 %v2330_v60, %s1896_s15 }
 0x1c1   : > { %v1048_v35 = vpop.permute.xlu0 %1047  ;;  %v954_v36 = vpop.permute.xlu1 %953 }
 0x1c2   : > { %1143 = vst.msk [vmem:[%s2511_s20] sm:$0xf] %vm886_vm1, %v1048_v35  ;;  %1032 = vst.msk [vmem:[%s2497_s10 + $0x44] sm:$0xf] %vm886_vm1, %v954_v36 }
 0x1c3   : > { %947 = vrot.lane.b32.xlu0 %v2356_v23, %s1894_s29  ;;  %949 = vrot.lane.b32.xlu1 %v2375_v17, %s1894_s29 }
 0x1c5   : > { %v1080_v37 = vpop.permute.xlu0 %1079  ;;  %v1050_v38 = vpop.permute.xlu1 %1049 }
 0x1c6   : > { %1159 = vst.msk [vmem:[%s2511_s20 + $0x40] sm:$0xf] %vm886_vm1, %v1080_v37  ;;  %1144 = vst.msk [vmem:[%s2511_s20 + $0x4] sm:$0xf] %vm886_vm1, %v1050_v38 }
 0x1c7   : > { %979 = vrot.lane.b32.xlu0 %v2359_v25, %s1894_s29  ;;  %981 = vrot.lane.b32.xlu1 %v2389_v33, %s1894_s29 }
 0x1c9   : > { %v1176_v39 = vpop.permute.xlu0 %1175  ;;  %v1082_v41 = vpop.permute.xlu1 %1081 }
 0x1ca   : > { %1272 = vst.msk [vmem:[%s2531_s17] sm:$0xf] %vm1271_vm2, %v1176_v39 }
 0x1cb   : > { %1160 = vst.msk [vmem:[%s2511_s20 + $0x44] sm:$0xf] %vm886_vm1, %v1082_v41  ;;  %1075 = vrot.lane.b32.xlu0 %v2356_v23, %s1895_s12  ;;  %1077 = vrot.lane.b32.xlu1 %v2375_v17, %s1895_s12 }
 0x1cd   : > { %v1208_v42 = vpop.permute.xlu0 %1207  ;;  %v1178_v45 = vpop.permute.xlu1 %1177 }
 0x1ce   : > { %1288 = vst.msk [vmem:[%s2531_s17 + $0x40] sm:$0xf] %vm1271_vm2, %v1208_v42  ;;  %1273 = vst.msk [vmem:[%s2531_s17 + $0x4] sm:$0xf] %vm1271_vm2, %v1178_v45 }
 0x1cf   : > { %1107 = vrot.lane.b32.xlu0 %v2359_v25, %s1895_s12  ;;  %1109 = vrot.lane.b32.xlu1 %v2389_v33, %s1895_s12 }
 0x1d1   : > { %v1210_v46 = vpop.permute.xlu1 %1209  ;;  %v922_v51 = vpop.permute.xlu0 %921 }
 0x1d2   : > { %1289 = vst.msk [vmem:[%s2531_s17 + $0x44] sm:$0xf] %vm1271_vm2, %v1210_v46 }
 0x1d3   : > { %1016 = vst.msk [vmem:[%s2497_s10 + $0x4] sm:$0xf] %vm886_vm1, %v922_v51  ;;  %1203 = vrot.lane.b32.xlu0 %v2356_v23, %s1896_s15  ;;  %1205 = vrot.lane.b32.xlu1 %v2375_v17, %s1896_s15 }
 0x1d5   : > { %v932_v52 = vpop.permute.xlu0 %931  ;;  %v934_v53 = vpop.permute.xlu1 %933 }
 0x1d6   : > { %1021 = vst.msk [vmem:[%s2497_s10 + $0x18] sm:$0xf] %vm886_vm1, %v932_v52  ;;  %1022 = vst.msk [vmem:[%s2497_s10 + $0x1c] sm:$0xf] %vm886_vm1, %v934_v53 }
 0x1d7   : > { %943 = vrot.lane.b32.xlu0 %v2362_v27, %s1894_s29  ;;  %945 = vrot.lane.b32.xlu1 %v2384_v32, %s1894_s29 }
 0x1d9   : > { %v964_v54 = vpop.permute.xlu0 %963  ;;  %v966_v55 = vpop.permute.xlu1 %965 }
 0x1da   : > { %1037 = vst.msk [vmem:[%s2497_s10 + $0x58] sm:$0xf] %vm886_vm1, %v964_v54  ;;  %1038 = vst.msk [vmem:[%s2497_s10 + $0x5c] sm:$0xf] %vm886_vm1, %v966_v55 }
 0x1db   : > { %975 = vrot.lane.b32.xlu0 %v2365_v29, %s1894_s29  ;;  %977 = vrot.lane.b32.xlu1 %v2394_v48, %s1894_s29 }
 0x1dd   : > { %v1060_v56 = vpop.permute.xlu0 %1059  ;;  %v1062_v57 = vpop.permute.xlu1 %1061 }
 0x1de   : > { %1149 = vst.msk [vmem:[%s2511_s20 + $0x18] sm:$0xf] %vm886_vm1, %v1060_v56  ;;  %1150 = vst.msk [vmem:[%s2511_s20 + $0x1c] sm:$0xf] %vm886_vm1, %v1062_v57 }
 0x1df   : > { %1071 = vrot.lane.b32.xlu0 %v2362_v27, %s1895_s12  ;;  %1073 = vrot.lane.b32.xlu1 %v2384_v32, %s1895_s12 }
 0x1e1   : > { %v1092_v40 = vpop.permute.xlu0 %1091  ;;  %v1094_v58 = vpop.permute.xlu1 %1093 }
 0x1e2   : > { %1165 = vst.msk [vmem:[%s2511_s20 + $0x58] sm:$0xf] %vm886_vm1, %v1092_v40  ;;  %1166 = vst.msk [vmem:[%s2511_s20 + $0x5c] sm:$0xf] %vm886_vm1, %v1094_v58 }
 0x1e3   : > { %1103 = vrot.lane.b32.xlu0 %v2365_v29, %s1895_s12  ;;  %1105 = vrot.lane.b32.xlu1 %v2394_v48, %s1895_s12  ;;  %s2778_s12 = scalar_lea.hbm %s2835_s7, %s1625_s11 }
 0x1e5   : > { %v1188_v59 = vpop.permute.xlu0 %1187  ;;  %v1190_v60 = vpop.permute.xlu1 %1189 }
 0x1e6   : > { %1278 = vst.msk [vmem:[%s2531_s17 + $0x18] sm:$0xf] %vm1271_vm2, %v1188_v59  ;;  %1279 = vst.msk [vmem:[%s2531_s17 + $0x1c] sm:$0xf] %vm1271_vm2, %v1190_v60 }
 0x1e7   : > { %1199 = vrot.lane.b32.xlu0 %v2362_v27, %s1896_s15  ;;  %1201 = vrot.lane.b32.xlu1 %v2384_v32, %s1896_s15 }
 0x1e9   : > { %v1220_v61 = vpop.permute.xlu0 %1219  ;;  %v1222_v62 = vpop.permute.xlu1 %1221 }
 0x1ea   : > { %1294 = vst.msk [vmem:[%s2531_s17 + $0x58] sm:$0xf] %vm1271_vm2, %v1220_v61  ;;  %1295 = vst.msk [vmem:[%s2531_s17 + $0x5c] sm:$0xf] %vm1271_vm2, %v1222_v62 }
 0x1eb   : > { %1231 = vrot.lane.b32.xlu0 %v2365_v29, %s1896_s15  ;;  %1233 = vrot.lane.b32.xlu1 %v2394_v48, %s1896_s15 }
 0x1ed   : > { %v928_v63 = vpop.permute.xlu0 %927  ;;  %v930_v0 = vpop.permute.xlu1 %929 }
 0x1ee   : > { %1019 = vst.msk [vmem:[%s2497_s10 + $0x10] sm:$0xf] %vm886_vm1, %v928_v63  ;;  %1020 = vst.msk [vmem:[%s2497_s10 + $0x14] sm:$0xf] %vm886_vm1, %v930_v0 }
 0x1ef   : > { %1235 = vrot.lane.b32.xlu0 %v2359_v25, %s1896_s15  ;;  %1237 = vrot.lane.b32.xlu1 %v2389_v33, %s1896_s15  ;;  %s1818_s15 = scalar_lea.vmem %s2780_s21, 2048 }
 0x1f0   : > { %p1819_p6 = scmp.ne.s32.totalorder %s2780_s21, %s1818_s15 }
 0x1f1   : > { %v960_v1 = vpop.permute.xlu0 %959  ;;  %v962_v2 = vpop.permute.xlu1 %961 }
 0x1f2   : > { %1035 = vst.msk [vmem:[%s2497_s10 + $0x50] sm:$0xf] %vm886_vm1, %v960_v1  ;;  %1036 = vst.msk [vmem:[%s2497_s10 + $0x54] sm:$0xf] %vm886_vm1, %v962_v2  ;;  %p1820_p8 = pnand %p1819_p6, %p2034_p12 }
 0x1f4   : > { %p1821_p10 = pneg %p1820_p8 }
 0x1f5   : > { %v1056_v3 = vpop.permute.xlu0 %1055  ;;  %v1058_v4 = vpop.permute.xlu1 %1057 }
 0x1f6   : > { %1147 = vst.msk [vmem:[%s2511_s20 + $0x10] sm:$0xf] %vm886_vm1, %v1056_v3  ;;  %1148 = vst.msk [vmem:[%s2511_s20 + $0x14] sm:$0xf] %vm886_vm1, %v1058_v4 }
 0x1f9   : > { %v1088_v5 = vpop.permute.xlu0 %1087  ;;  %v1090_v7 = vpop.permute.xlu1 %1089 }
 0x1fa   : > { %1163 = vst.msk [vmem:[%s2511_s20 + $0x50] sm:$0xf] %vm886_vm1, %v1088_v5  ;;  %1164 = vst.msk [vmem:[%s2511_s20 + $0x54] sm:$0xf] %vm886_vm1, %v1090_v7 }
 0x1fd   : > { %v1184_v9 = vpop.permute.xlu0 %1183  ;;  %v1186_v11 = vpop.permute.xlu1 %1185 }
 0x1fe   : > { %1276 = vst.msk [vmem:[%s2531_s17 + $0x10] sm:$0xf] %vm1271_vm2, %v1184_v9  ;;  %1277 = vst.msk [vmem:[%s2531_s17 + $0x14] sm:$0xf] %vm1271_vm2, %v1186_v11 }
 0x201   : > { %v1216_v13 = vpop.permute.xlu0 %1215  ;;  %v1218_v15 = vpop.permute.xlu1 %1217 }
 0x202   : > { %1292 = vst.msk [vmem:[%s2531_s17 + $0x50] sm:$0xf] %vm1271_vm2, %v1216_v13  ;;  %1293 = vst.msk [vmem:[%s2531_s17 + $0x54] sm:$0xf] %vm1271_vm2, %v1218_v15 }
 0x205   : > { %v940_v20 = vpop.permute.xlu0 %939  ;;  %v942_v21 = vpop.permute.xlu1 %941 }
 0x206   : > { %1025 = vst.msk [vmem:[%s2497_s10 + $0x28] sm:$0xf] %vm886_vm1, %v940_v20  ;;  %1026 = vst.msk [vmem:[%s2497_s10 + $0x2c] sm:$0xf] %vm886_vm1, %v942_v21 }
 0x209   : > { %v972_v47 = vpop.permute.xlu0 %971  ;;  %v974_v23 = vpop.permute.xlu1 %973 }
 0x20a   : > { %1041 = vst.msk [vmem:[%s2497_s10 + $0x68] sm:$0xf] %vm886_vm1, %v972_v47  ;;  %1042 = vst.msk [vmem:[%s2497_s10 + $0x6c] sm:$0xf] %vm886_vm1, %v974_v23 }
 0x20d   : > { %v1068_v24 = vpop.permute.xlu0 %1067  ;;  %v1070_v25 = vpop.permute.xlu1 %1069 }
 0x20e   : > { %1153 = vst.msk [vmem:[%s2511_s20 + $0x28] sm:$0xf] %vm886_vm1, %v1068_v24  ;;  %1154 = vst.msk [vmem:[%s2511_s20 + $0x2c] sm:$0xf] %vm886_vm1, %v1070_v25 }
 0x211   : > { %v1100_v26 = vpop.permute.xlu0 %1099  ;;  %v1102_v27 = vpop.permute.xlu1 %1101 }
 0x212   : > { %1169 = vst.msk [vmem:[%s2511_s20 + $0x68] sm:$0xf] %vm886_vm1, %v1100_v26  ;;  %1170 = vst.msk [vmem:[%s2511_s20 + $0x6c] sm:$0xf] %vm886_vm1, %v1102_v27 }
 0x215   : > { %v1196_v28 = vpop.permute.xlu0 %1195  ;;  %v1198_v29 = vpop.permute.xlu1 %1197 }
 0x216   : > { %1282 = vst.msk [vmem:[%s2531_s17 + $0x28] sm:$0xf] %vm1271_vm2, %v1196_v28  ;;  %1283 = vst.msk [vmem:[%s2531_s17 + $0x2c] sm:$0xf] %vm1271_vm2, %v1198_v29 }
 0x219   : > { %v1228_v30 = vpop.permute.xlu0 %1227  ;;  %v1230_v17 = vpop.permute.xlu1 %1229 }
 0x21a   : > { %1298 = vst.msk [vmem:[%s2531_s17 + $0x68] sm:$0xf] %vm1271_vm2, %v1228_v30  ;;  %1299 = vst.msk [vmem:[%s2531_s17 + $0x6c] sm:$0xf] %vm1271_vm2, %v1230_v17 }
 0x21d   : > { %v936_v31 = vpop.permute.xlu0 %935  ;;  %v938_v32 = vpop.permute.xlu1 %937 }
 0x21e   : > { %1023 = vst.msk [vmem:[%s2497_s10 + $0x20] sm:$0xf] %vm886_vm1, %v936_v31  ;;  %1024 = vst.msk [vmem:[%s2497_s10 + $0x24] sm:$0xf] %vm886_vm1, %v938_v32 }
 0x221   : > { %v968_v33 = vpop.permute.xlu0 %967  ;;  %v970_v48 = vpop.permute.xlu1 %969 }
 0x222   : > { %1039 = vst.msk [vmem:[%s2497_s10 + $0x60] sm:$0xf] %vm886_vm1, %v968_v33  ;;  %1040 = vst.msk [vmem:[%s2497_s10 + $0x64] sm:$0xf] %vm886_vm1, %v970_v48 }
 0x225   : > { %v1064_v19 = vpop.permute.xlu0 %1063  ;;  %v1066_v43 = vpop.permute.xlu1 %1065 }
 0x226   : > { %1151 = vst.msk [vmem:[%s2511_s20 + $0x20] sm:$0xf] %vm886_vm1, %v1064_v19  ;;  %1152 = vst.msk [vmem:[%s2511_s20 + $0x24] sm:$0xf] %vm886_vm1, %v1066_v43 }
 0x229   : > { %v1096_v44 = vpop.permute.xlu0 %1095  ;;  %v1098_v49 = vpop.permute.xlu1 %1097 }
 0x22a   : > { %1167 = vst.msk [vmem:[%s2511_s20 + $0x60] sm:$0xf] %vm886_vm1, %v1096_v44  ;;  %1168 = vst.msk [vmem:[%s2511_s20 + $0x64] sm:$0xf] %vm886_vm1, %v1098_v49 }
 0x22d   : > { %v1192_v50 = vpop.permute.xlu0 %1191  ;;  %v1194_v6 = vpop.permute.xlu1 %1193 }
 0x22e   : > { %1280 = vst.msk [vmem:[%s2531_s17 + $0x20] sm:$0xf] %vm1271_vm2, %v1192_v50  ;;  %1281 = vst.msk [vmem:[%s2531_s17 + $0x24] sm:$0xf] %vm1271_vm2, %v1194_v6 }
 0x231   : > { %v1224_v8 = vpop.permute.xlu0 %1223  ;;  %v1226_v10 = vpop.permute.xlu1 %1225 }
 0x232   : > { %1296 = vst.msk [vmem:[%s2531_s17 + $0x60] sm:$0xf] %vm1271_vm2, %v1224_v8  ;;  %1297 = vst.msk [vmem:[%s2531_s17 + $0x64] sm:$0xf] %vm1271_vm2, %v1226_v10 }
 0x235   : > { %v948_v12 = vpop.permute.xlu0 %947  ;;  %v950_v14 = vpop.permute.xlu1 %949 }
 0x236   : > { %1029 = vst.msk [vmem:[%s2497_s10 + $0x38] sm:$0xf] %vm886_vm1, %v948_v12  ;;  %1030 = vst.msk [vmem:[%s2497_s10 + $0x3c] sm:$0xf] %vm886_vm1, %v950_v14 }
 0x239   : > { %v980_v16 = vpop.permute.xlu0 %979  ;;  %v982_v18 = vpop.permute.xlu1 %981 }
 0x23a   : > { %1045 = vst.msk [vmem:[%s2497_s10 + $0x78] sm:$0xf] %vm886_vm1, %v980_v16  ;;  %1046 = vst.msk [vmem:[%s2497_s10 + $0x7c] sm:$0xf] %vm886_vm1, %v982_v18 }
 0x23d   : > { %v1076_v22 = vpop.permute.xlu0 %1075  ;;  %v1078_v34 = vpop.permute.xlu1 %1077 }
 0x23e   : > { %1157 = vst.msk [vmem:[%s2511_s20 + $0x38] sm:$0xf] %vm886_vm1, %v1076_v22  ;;  %1158 = vst.msk [vmem:[%s2511_s20 + $0x3c] sm:$0xf] %vm886_vm1, %v1078_v34 }
 0x241   : > { %v1108_v35 = vpop.permute.xlu0 %1107  ;;  %v1110_v36 = vpop.permute.xlu1 %1109 }
 0x242   : > { %1173 = vst.msk [vmem:[%s2511_s20 + $0x78] sm:$0xf] %vm886_vm1, %v1108_v35  ;;  %1174 = vst.msk [vmem:[%s2511_s20 + $0x7c] sm:$0xf] %vm886_vm1, %v1110_v36 }
 0x245   : > { %v1204_v37 = vpop.permute.xlu0 %1203  ;;  %v1206_v38 = vpop.permute.xlu1 %1205 }
 0x246   : > { %1286 = vst.msk [vmem:[%s2531_s17 + $0x38] sm:$0xf] %vm1271_vm2, %v1204_v37  ;;  %1287 = vst.msk [vmem:[%s2531_s17 + $0x3c] sm:$0xf] %vm1271_vm2, %v1206_v38 }
 0x249   : > { %v944_v39 = vpop.permute.xlu0 %943  ;;  %v946_v41 = vpop.permute.xlu1 %945 }
 0x24a   : > { %1027 = vst.msk [vmem:[%s2497_s10 + $0x30] sm:$0xf] %vm886_vm1, %v944_v39  ;;  %1028 = vst.msk [vmem:[%s2497_s10 + $0x34] sm:$0xf] %vm886_vm1, %v946_v41 }
 0x24d   : > { %v976_v42 = vpop.permute.xlu0 %975  ;;  %v978_v45 = vpop.permute.xlu1 %977 }
 0x24e   : > { %1043 = vst.msk [vmem:[%s2497_s10 + $0x70] sm:$0xf] %vm886_vm1, %v976_v42  ;;  %1044 = vst.msk [vmem:[%s2497_s10 + $0x74] sm:$0xf] %vm886_vm1, %v978_v45  ;;  %s1824_s10 = scalar_lea.vmem %s1823_s9, 4096 }
 0x24f   : > { %p1826_p3 = scmp.lt.s32.totalorder %s1824_s10, %s1818_s15 }
 0x251   : > { %v1072_v46 = vpop.permute.xlu0 %1071  ;;  %v1074_v51 = vpop.permute.xlu1 %1073  ;;  %p1827_p7 = por %p1826_p3, %p1825_p13 }
 0x252   : > { %1155 = vst.msk [vmem:[%s2511_s20 + $0x30] sm:$0xf] %vm886_vm1, %v1072_v46  ;;  %1156 = vst.msk [vmem:[%s2511_s20 + $0x34] sm:$0xf] %vm886_vm1, %v1074_v51 }
 0x253   : > { %p1828_p9 = pnand %p1827_p7, %p1821_p10 }
 0x255   : > { %v1104_v52 = vpop.permute.xlu0 %1103  ;;  %v1106_v53 = vpop.permute.xlu1 %1105 }
 0x256   : > { %1171 = vst.msk [vmem:[%s2511_s20 + $0x70] sm:$0xf] %vm886_vm1, %v1104_v52  ;;  %1172 = vst.msk [vmem:[%s2511_s20 + $0x74] sm:$0xf] %vm886_vm1, %v1106_v53 }
 0x259   : > { %v1200_v54 = vpop.permute.xlu0 %1199  ;;  %v1202_v55 = vpop.permute.xlu1 %1201 }
 0x25a   : > { %1284 = vst.msk [vmem:[%s2531_s17 + $0x30] sm:$0xf] %vm1271_vm2, %v1200_v54  ;;  %1285 = vst.msk [vmem:[%s2531_s17 + $0x34] sm:$0xf] %vm1271_vm2, %v1202_v55 }
 0x25d   : > { %v1232_v56 = vpop.permute.xlu0 %1231  ;;  %v1234_v57 = vpop.permute.xlu1 %1233 }
 0x25e   : > { %1300 = vst.msk [vmem:[%s2531_s17 + $0x70] sm:$0xf] %vm1271_vm2, %v1232_v56  ;;  %1301 = vst.msk [vmem:[%s2531_s17 + $0x74] sm:$0xf] %vm1271_vm2, %v1234_v57 }
 0x261   : > { %v1236_v40 = vpop.permute.xlu0 %1235  ;;  %v1238_v58 = vpop.permute.xlu1 %1237 }
 0x262   : > { %1302 = vst.msk [vmem:[%s2531_s17 + $0x78] sm:$0xf] %vm1271_vm2, %v1236_v40  ;;  %1303 = vst.msk [vmem:[%s2531_s17 + $0x7c] sm:$0xf] %vm1271_vm2, %v1238_v58 }
 0x263   : > { %1831 = shalt.err (!%p1828_p9)
}
 0x264   : > { %s1832_s16 = scalar_lea.hbm %s2778_s12, 2048  ;;  %s1836_s17 = scalar_lea.hbm %s2835_s7, 4096 }
 0x265   : > { %p1833_p1 = scmp.ne.s32.totalorder %s2778_s12, %s1832_s16  ;;  %p1837_p11 = scmp.lt.u32.totalorder %s2778_s12, %s2835_s7 }
 0x266   : > { %p1838_p2 = scmp.lt.u32.totalorder %s1836_s17, %s1832_s16  ;;  %p1840_p6 = scmp.lt.u32.totalorder %s1832_s16, %s2778_s12 }
 0x267   : > { %p1834_p0 = pnand %p1833_p1, %p2034_p12 }
 0x268   : > { %p1839_p4 = por %p1838_p2, %p1837_p11 }
 0x269   : > { %p1835_p5 = pneg %p1834_p0 }
 0x26a   : > { %p1841_p8 = por %p1840_p6, %p1839_p4 }
 0x26c   : > { %p1842_p10 = pnand %p1841_p8, %p1835_p5 }
 0x26e   : > { %1845 = shalt.err (!%p1842_p10)
}
 0x26f   : > { %s1898_s29 = smov 64   ;;  %s1899_s15 = smov 4  }
 0x270   : > { %1685 = dma.vmem_to_hbm [thread:$0]  (%p2034_p12), %s2780_s21, 2048, %s2778_s12, %s1320_s28, %s1898_s29, %s1898_s29, %s1899_s15  }
 0x271 PF: > { %s1381_s30 = sand.u32 1, %s1876_s24   ;;  %p2852_p13 = scmp.ne.s32.totalorder %s2841_s8, 0 }
 0x272   : > { %p2853_p3 = scmp.ge.s32.totalorder %s1888_s27, 2  ;;  %s1382_s9 = scalar_lea.sflag [#allocation4], %s1381_s30 }
 0x274   : > { %p1696_p7 = pnand %p2853_p3, %p2852_p13 }
 0x276   : > { %1871 = dma.done.wait (!%p1696_p7), %s1382_s9, 2048  }
 0x277   : > { %1873 = vsyncadd (!%p1696_p7), %s1382_s9, 4294965248  ;;  %p22_p9 = scmp.ge.s32.totalorder %s1996_s13, 4   ;;  %s2854_s24 = smov %s1880_s25 }
 0x278   : > { %s2855_s25 = smov %s1884_s26  ;;  %s2856_s26 = smov %s2030_s18 }
 0x279   : > { %s2857_s27 = smov %s1996_s13  ;;  %24 = sbr.rel (!%p22_p9) target bundleno = 6 (0x6), region = 121 }
 0x280   :  { %1387 = vsyncpa [#allocation3], 1 }
 0x281   :  { %1389 = vsyncpa [#allocation3 + $0x1], 1 }
 0x282   :  { %1390 = vsyncpa [#allocation6], 1 }
 0x283   :  { %1391 = vsyncpa [#allocation4], 1 }
 0x284   :  { %1393 = vsyncpa [#allocation4 + $0x1], 1 }

</bundles_post_ra>
